<compile_context>
chip_gen: v5e
topology: v5e:2x2
jax: 0.10.0
libtpu: 0.0.40
codegen_flags: <defaults>
</compile_context>

<pallas_src>
import functools

import jax
import jax.numpy as jnp
from jax.experimental import pallas as pl
from jax.experimental.pallas import tpu as pltpu


def _proj_ln_kernel(emb_ref, w_ref, r_flat_ref, r_bias_ref, gamma_ref, beta_ref,
                    o_ref, *, eps, n_base, mxu_dtype):
    emb = emb_ref[...]                                   # [tb, D]      f32
    w = w_ref[...]                                       # [tb, n_base] f32

    # Khatri-Rao expansion in VMEM: u[b, i*D+q] = w[b, i] * emb[b, q]
    # (f32 broadcast-multiplies on the VPU; cast to bf16 only at the MXU operand).
    parts = [w[:, i:i + 1] * emb for i in range(n_base)]
    u = parts[0] if n_base == 1 else jnp.concatenate(parts, axis=-1)   # [tb, n_base*D]

    # Single MXU matmul against the resident folded transform, f32 accumulate.
    x = jnp.dot(u.astype(mxu_dtype), r_flat_ref[...],
                preferred_element_type=jnp.float32)                    # [tb, D]

    # Bias: n_base VPU FMAs against resident r_bias rows (keeps K = n_base*D exact).
    for i in range(n_base):
        x = x + w[:, i:i + 1] * r_bias_ref[i:i + 1, :]

    # Two-pass LayerNorm (biased variance, matches torch nn.LayerNorm).
    mean = jnp.mean(x, axis=-1, keepdims=True)
    xc = x - mean
    var = jnp.mean(xc * xc, axis=-1, keepdims=True)
    inv_std = jax.lax.rsqrt(var + eps)                                  # EUP
    o_ref[...] = (xc * inv_std) * gamma_ref[...] + beta_ref[...]


def projection_net_forward(emb, proj_ids, att, r_trans, r_bias, gamma, beta,
                           eps=1e-5, mxu_dtype=jnp.bfloat16, block_b=1024):
    B, D = emb.shape
    n_base = r_trans.shape[0]
    K = n_base * D

    # Glue: index_select / gather of attention rows stays in plain JAX.
    w = att[proj_ids].astype(jnp.float32)                               # [B, n_base]
    emb = emb.astype(jnp.float32)

    # Fold the transform once at trace time (tiny array):
    #   r_flat[i*D + q, p] = r_trans[i, p, q]   so   x = u @ r_flat  with K = n_base*D.
    r_flat = jnp.transpose(r_trans.astype(jnp.float32), (0, 2, 1)).reshape(K, D)
    r_flat = r_flat.astype(mxu_dtype)
    r_bias2 = r_bias.astype(jnp.float32)          # bias path is VPU, keep f32 precision
    gamma2 = gamma.reshape(1, D).astype(jnp.float32)
    beta2 = beta.reshape(1, D).astype(jnp.float32)

    # --- batch tile sizing ---------------------------------------------------
    # Large tiles amortize the ~0.35 us/step pipeline overhead; multiple of 16 for
    # bf16 sublane packing; >= 2 grid steps whenever B allows (v7x dual-TC); capped
    # by a VMEM estimate against the tightest scoped default (v5e 16 MiB).
    tb = min(block_b, B)
    if B >= 32:
        tb = min(tb, -(-B // 2))                  # guarantee >= 2 grid steps
    if tb >= 16:
        tb = ((tb + 15) // 16) * 16
    else:
        tb = max(8, ((tb + 7) // 8) * 8)

    itemsize = jnp.dtype(mxu_dtype).itemsize

    def _vmem_bytes(t):
        per_tile_io = 2 * (t * D + t * n_base) * 4 + 2 * t * D * 4      # double-buffered in/out
        resident = K * D * itemsize + n_base * D * 4 + 2 * D * 4        # weights
        return per_tile_io + resident

    while tb > 16 and _vmem_bytes(tb) > 12 * 1024 * 1024:
        tb //= 2

    bp = pl.cdiv(B, tb) * tb
    if bp != B:
        # Only the small per-row inputs get padded (no big B x K intermediate exists).
        emb = jnp.pad(emb, ((0, bp - B), (0, 0)))
        w = jnp.pad(w, ((0, bp - B), (0, 0)))

    kernel = functools.partial(_proj_ln_kernel, eps=eps, n_base=n_base,
                               mxu_dtype=mxu_dtype)
    cost = pl.CostEstimate(
        flops=2 * bp * K * D + 4 * bp * n_base * D,
        transcendentals=0,
        bytes_accessed=bp * (D + n_base) * 4 + bp * D * 4
                       + K * D * itemsize + (n_base + 2) * D * 4)

    out = pl.pallas_call(
        kernel,
        out_shape=jax.ShapeDtypeStruct((bp, D), jnp.float32),
        grid=(bp // tb,),
        in_specs=[
            pl.BlockSpec((tb, D), lambda i: (i, 0)),        # emb: batch-blocked, double-buffered
            pl.BlockSpec((tb, n_base), lambda i: (i, 0)),   # w:   batch-blocked
            pl.BlockSpec((K, D), lambda i: (0, 0)),         # folded r_trans: VMEM-resident
            pl.BlockSpec((n_base, D), lambda i: (0, 0)),    # r_bias: resident
            pl.BlockSpec((1, D), lambda i: (0, 0)),         # gamma: resident
            pl.BlockSpec((1, D), lambda i: (0, 0)),         # beta: resident
        ],
        out_specs=pl.BlockSpec((tb, D), lambda i: (i, 0)),
        compiler_params=pltpu.CompilerParams(
            dimension_semantics=("parallel",)),             # batch axis shards across TCs (v7x)
        cost_estimate=cost,
    )(emb, w, r_flat, r_bias2, gamma2, beta2)
    return out[:B]


def _reference(emb, proj_ids, att, r_trans, r_bias, gamma, beta, eps=1e-5):
    w = att[proj_ids]
    pt = jnp.einsum('bi,ijk->bjk', w, r_trans)
    pb = jnp.einsum('bi,ij->bj', w, r_bias)
    x = jnp.einsum('bij,bj->bi', pt, emb) + pb
    mu = x.mean(-1, keepdims=True)
    var = ((x - mu) ** 2).mean(-1, keepdims=True)
    return (x - mu) / jnp.sqrt(var + eps) * gamma + beta


if __name__ == "__main__":
    key = jax.random.PRNGKey(0)
    D, R, NB = 32, 16, 4                  # entity_dim, n_relation, rel_num_base
    k1, k2, k3, k4, k5 = jax.random.split(key, 5)

    # deterministic synthetic parameter init (shapes match the module __init__)
    att = jax.random.normal(k1, (R, NB), jnp.float32) * (2.0 / (R + NB)) ** 0.5      # xavier_normal_
    r_trans = jax.nn.initializers.orthogonal()(k2, (NB, D, D), jnp.float32)           # orthogonal_
    r_bias = jax.random.normal(k3, (NB, D), jnp.float32) * (2.0 / (NB + D)) ** 0.5    # xavier_normal_
    gamma = jnp.ones((D,), jnp.float32)    # LayerNorm weight default
    beta = jnp.zeros((D,), jnp.float32)    # LayerNorm bias default

    # Case 1: small batch (single grid step) — exact f32 MXU path vs reference.
    B = 8
    emb = jax.random.normal(k4, (B, D), jnp.float32)
    proj_ids = jax.random.randint(k5, (B,), 0, R)
    ref = _reference(emb, proj_ids, att, r_trans, r_bias, gamma, beta)

    out_f32 = jax.block_until_ready(projection_net_forward(
        emb, proj_ids, att, r_trans, r_bias, gamma, beta, mxu_dtype=jnp.float32))
    assert jnp.allclose(out_f32, ref, atol=1e-4, rtol=1e-4), "f32 mismatch vs reference"

    # Default bf16 fast path: product w*emb and r_flat quantized to bf16, f32 accum/LN.
    out_bf16 = jax.block_until_ready(projection_net_forward(
        emb, proj_ids, att, r_trans, r_bias, gamma, beta, mxu_dtype=jnp.bfloat16))
    w_ref = att[proj_ids]
    u = (w_ref[:, :, None] * emb[:, None, :]).reshape(B, NB * D)
    r_flat = jnp.transpose(r_trans, (0, 2, 1)).reshape(NB * D, D)
    xq = jnp.dot(u.astype(jnp.bfloat16).astype(jnp.float32),
                 r_flat.astype(jnp.bfloat16).astype(jnp.float32)) + w_ref @ r_bias
    muq = xq.mean(-1, keepdims=True)
    varq = ((xq - muq) ** 2).mean(-1, keepdims=True)
    ref_bf16 = (xq - muq) / jnp.sqrt(varq + 1e-5) * gamma + beta
    assert jnp.allclose(out_bf16, ref_bf16, atol=2e-3, rtol=2e-3), "bf16 mismatch vs quantized ref"
    assert jnp.allclose(out_bf16, ref, atol=5e-2, rtol=5e-2), "bf16 drift vs exact ref"

    # Case 2: ragged batch exercising padding + a 2-step grid (v7x dual-TC path).
    B2 = 48
    emb2 = jax.random.normal(jax.random.fold_in(key, 7), (B2, D), jnp.float32)
    ids2 = jax.random.randint(jax.random.fold_in(key, 8), (B2,), 0, R)
    ref2 = _reference(emb2, ids2, att, r_trans, r_bias, gamma, beta)
    out2 = jax.block_until_ready(projection_net_forward(
        emb2, ids2, att, r_trans, r_bias, gamma, beta, mxu_dtype=jnp.float32))
    assert jnp.allclose(out2, ref2, atol=1e-4, rtol=1e-4), "f32 mismatch (padded / 2-step grid)"

    print("KERNEL_OK")
</pallas_src>

<mosaic_0001>
module attributes {stable_mosaic.version = 11 : i64} {
  func.func @_proj_ln_kernel(%arg0: i32, %arg1: memref<8x32xf32, #tpu.memory_space<vmem>>, %arg2: memref<8x4xf32, #tpu.memory_space<vmem>>, %arg3: memref<128x32xf32, #tpu.memory_space<vmem>>, %arg4: memref<4x32xf32, #tpu.memory_space<vmem>>, %arg5: memref<1x32xf32, #tpu.memory_space<vmem>>, %arg6: memref<1x32xf32, #tpu.memory_space<vmem>>, %arg7: memref<8x32xf32, #tpu.memory_space<vmem>>) attributes {dimension_semantics = [#tpu.dimension_semantics<parallel>], iteration_bounds = array<i64: 1>, scalar_prefetch = 0 : i64, scratch_operands = 0 : i64, tpu.core_type = #tpu.core_type<tc>, window_params = [{transform_indices = @transform_0, window_bounds = array<i64: 8, 32>}, {transform_indices = @transform_1, window_bounds = array<i64: 8, 4>}, {pipeline_mode = #tpu.pipeline_mode<synchronous>, transform_indices = @transform_2, window_bounds = array<i64: 128, 32>}, {pipeline_mode = #tpu.pipeline_mode<synchronous>, transform_indices = @transform_3, window_bounds = array<i64: 4, 32>}, {pipeline_mode = #tpu.pipeline_mode<synchronous>, transform_indices = @transform_4, window_bounds = array<i64: 1, 32>}, {pipeline_mode = #tpu.pipeline_mode<synchronous>, transform_indices = @transform_5, window_bounds = array<i64: 1, 32>}, {transform_indices = @transform_6, window_bounds = array<i64: 8, 32>}]} {
    %c0 = arith.constant 0 : index
    %c0_0 = arith.constant 0 : index
    %0 = vector.load %arg1[%c0, %c0_0] : memref<8x32xf32, #tpu.memory_space<vmem>>, vector<8x32xf32>
    %c0_1 = arith.constant 0 : index
    %c0_2 = arith.constant 0 : index
    %1 = vector.load %arg2[%c0_1, %c0_2] : memref<8x4xf32, #tpu.memory_space<vmem>>, vector<8x4xf32>
    %2 = vector.extract_strided_slice %1 {offsets = [0, 0], sizes = [8, 1], strides = [1, 1]} : vector<8x4xf32> to vector<8x1xf32>
    %3 = vector.broadcast %2 : vector<8x1xf32> to vector<8x32xf32>
    %4 = arith.mulf %3, %0 : vector<8x32xf32>
    %5 = vector.extract_strided_slice %1 {offsets = [0, 1], sizes = [8, 1], strides = [1, 1]} : vector<8x4xf32> to vector<8x1xf32>
    %6 = vector.broadcast %5 : vector<8x1xf32> to vector<8x32xf32>
    %7 = arith.mulf %6, %0 : vector<8x32xf32>
    %8 = vector.extract_strided_slice %1 {offsets = [0, 2], sizes = [8, 1], strides = [1, 1]} : vector<8x4xf32> to vector<8x1xf32>
    %9 = vector.broadcast %8 : vector<8x1xf32> to vector<8x32xf32>
    %10 = arith.mulf %9, %0 : vector<8x32xf32>
    %11 = vector.extract_strided_slice %1 {offsets = [0, 3], sizes = [8, 1], strides = [1, 1]} : vector<8x4xf32> to vector<8x1xf32>
    %12 = vector.broadcast %11 : vector<8x1xf32> to vector<8x32xf32>
    %13 = arith.mulf %12, %0 : vector<8x32xf32>
    %14 = tpu.concatenate %4, %7, %10, %13 in 1 : vector<8x32xf32>, vector<8x32xf32>, vector<8x32xf32>, vector<8x32xf32> -> vector<8x128xf32>
    %c0_3 = arith.constant 0 : index
    %c0_4 = arith.constant 0 : index
    %15 = vector.load %arg3[%c0_3, %c0_4] : memref<128x32xf32, #tpu.memory_space<vmem>>, vector<128x32xf32>
    %cst = arith.constant dense<0.000000e+00> : vector<8x32xf32>
    %16 = tpu.matmul %14, %15, %cst {dimension_numbers = #tpu.dot_dimension_numbers<[1], [0], [0], [1], [0, 0, 1, 1], [], []>} : vector<8x128xf32>, vector<128x32xf32>, vector<8x32xf32> -> vector<8x32xf32>
    %17 = vector.extract_strided_slice %1 {offsets = [0, 0], sizes = [8, 1], strides = [1, 1]} : vector<8x4xf32> to vector<8x1xf32>
    %c0_5 = arith.constant 0 : index
    %c0_6 = arith.constant 0 : index
    %18 = vector.load %arg4[%c0_5, %c0_6] : memref<4x32xf32, #tpu.memory_space<vmem>>, vector<1x32xf32>
    %19 = vector.broadcast %17 : vector<8x1xf32> to vector<8x32xf32>
    %20 = vector.broadcast %18 : vector<1x32xf32> to vector<8x32xf32>
    %21 = arith.mulf %19, %20 : vector<8x32xf32>
    %22 = arith.addf %16, %21 : vector<8x32xf32>
    %23 = vector.extract_strided_slice %1 {offsets = [0, 1], sizes = [8, 1], strides = [1, 1]} : vector<8x4xf32> to vector<8x1xf32>
    %c1 = arith.constant 1 : index
    %c0_7 = arith.constant 0 : index
    %24 = vector.load %arg4[%c1, %c0_7] : memref<4x32xf32, #tpu.memory_space<vmem>>, vector<1x32xf32>
    %25 = vector.broadcast %23 : vector<8x1xf32> to vector<8x32xf32>
    %26 = vector.broadcast %24 : vector<1x32xf32> to vector<8x32xf32>
    %27 = arith.mulf %25, %26 : vector<8x32xf32>
    %28 = arith.addf %22, %27 : vector<8x32xf32>
    %29 = vector.extract_strided_slice %1 {offsets = [0, 2], sizes = [8, 1], strides = [1, 1]} : vector<8x4xf32> to vector<8x1xf32>
    %c2 = arith.constant 2 : index
    %c0_8 = arith.constant 0 : index
    %30 = vector.load %arg4[%c2, %c0_8] : memref<4x32xf32, #tpu.memory_space<vmem>>, vector<1x32xf32>
    %31 = vector.broadcast %29 : vector<8x1xf32> to vector<8x32xf32>
    %32 = vector.broadcast %30 : vector<1x32xf32> to vector<8x32xf32>
    %33 = arith.mulf %31, %32 : vector<8x32xf32>
    %34 = arith.addf %28, %33 : vector<8x32xf32>
    %35 = vector.extract_strided_slice %1 {offsets = [0, 3], sizes = [8, 1], strides = [1, 1]} : vector<8x4xf32> to vector<8x1xf32>
    %c3 = arith.constant 3 : index
    %c0_9 = arith.constant 0 : index
    %36 = vector.load %arg4[%c3, %c0_9] : memref<4x32xf32, #tpu.memory_space<vmem>>, vector<1x32xf32>
    %37 = vector.broadcast %35 : vector<8x1xf32> to vector<8x32xf32>
    %38 = vector.broadcast %36 : vector<1x32xf32> to vector<8x32xf32>
    %39 = arith.mulf %37, %38 : vector<8x32xf32>
    %40 = arith.addf %34, %39 : vector<8x32xf32>
    %cst_10 = arith.constant dense<0.000000e+00> : vector<8xf32>
    %41 = vector.multi_reduction <add>, %40, %cst_10 [1] : vector<8x32xf32> to vector<8xf32>
    %42 = vector.shape_cast %41 : vector<8xf32> to vector<8x1xf32>
    %cst_11 = arith.constant 3.200000e+01 : f32
    %43 = vector.broadcast %cst_11 : f32 to vector<8x1xf32>
    %44 = arith.divf %42, %43 : vector<8x1xf32>
    %45 = vector.broadcast %44 : vector<8x1xf32> to vector<8x32xf32>
    %46 = arith.subf %40, %45 : vector<8x32xf32>
    %47 = arith.mulf %46, %46 : vector<8x32xf32>
    %cst_12 = arith.constant dense<0.000000e+00> : vector<8xf32>
    %48 = vector.multi_reduction <add>, %47, %cst_12 [1] : vector<8x32xf32> to vector<8xf32>
    %49 = vector.shape_cast %48 : vector<8xf32> to vector<8x1xf32>
    %cst_13 = arith.constant 3.200000e+01 : f32
    %50 = vector.broadcast %cst_13 : f32 to vector<8x1xf32>
    %51 = arith.divf %49, %50 : vector<8x1xf32>
    %cst_14 = arith.constant 9.99999974E-6 : f32
    %52 = vector.broadcast %cst_14 : f32 to vector<8x1xf32>
    %53 = arith.addf %51, %52 : vector<8x1xf32>
    %54 = math.rsqrt %53 : vector<8x1xf32>
    %55 = vector.broadcast %54 : vector<8x1xf32> to vector<8x32xf32>
    %56 = arith.mulf %46, %55 : vector<8x32xf32>
    %c0_15 = arith.constant 0 : index
    %c0_16 = arith.constant 0 : index
    %57 = vector.load %arg5[%c0_15, %c0_16] : memref<1x32xf32, #tpu.memory_space<vmem>>, vector<1x32xf32>
    %58 = vector.broadcast %57 : vector<1x32xf32> to vector<8x32xf32>
    %59 = arith.mulf %56, %58 : vector<8x32xf32>
    %c0_17 = arith.constant 0 : index
    %c0_18 = arith.constant 0 : index
    %60 = vector.load %arg6[%c0_17, %c0_18] : memref<1x32xf32, #tpu.memory_space<vmem>>, vector<1x32xf32>
    %61 = vector.broadcast %60 : vector<1x32xf32> to vector<8x32xf32>
    %62 = arith.addf %59, %61 : vector<8x32xf32>
    %c0_19 = arith.constant 0 : index
    %c0_20 = arith.constant 0 : index
    %63 = vector.load %arg7[%c0_19, %c0_20] : memref<8x32xf32, #tpu.memory_space<vmem>>, vector<8x32xf32>
    tpu.vector_store %arg7[%c0_19, %c0_20], %62 {strides = array<i32>} : memref<8x32xf32, #tpu.memory_space<vmem>>, vector<8x32xf32>,
    return
  }
  func.func @transform_0(%arg0: i32) -> (i32, i32) {
    %c0_i32 = arith.constant 0 : i32
    %c0_i32_0 = arith.constant 0 : i32
    return %arg0, %c0_i32 : i32, i32
  }
  func.func @transform_1(%arg0: i32) -> (i32, i32) {
    %c0_i32 = arith.constant 0 : i32
    %c0_i32_0 = arith.constant 0 : i32
    return %arg0, %c0_i32 : i32, i32
  }
  func.func @transform_2(%arg0: i32) -> (i32, i32) {
    %c0_i32 = arith.constant 0 : i32
    %c0_i32_0 = arith.constant 0 : i32
    %c0_i32_1 = arith.constant 0 : i32
    return %c0_i32, %c0_i32_0 : i32, i32
  }
  func.func @transform_3(%arg0: i32) -> (i32, i32) {
    %c0_i32 = arith.constant 0 : i32
    %c0_i32_0 = arith.constant 0 : i32
    %c0_i32_1 = arith.constant 0 : i32
    return %c0_i32, %c0_i32_0 : i32, i32
  }
  func.func @transform_4(%arg0: i32) -> (i32, i32) {
    %c0_i32 = arith.constant 0 : i32
    %c0_i32_0 = arith.constant 0 : i32
    %c0_i32_1 = arith.constant 0 : i32
    return %c0_i32, %c0_i32_0 : i32, i32
  }
  func.func @transform_5(%arg0: i32) -> (i32, i32) {
    %c0_i32 = arith.constant 0 : i32
    %c0_i32_0 = arith.constant 0 : i32
    %c0_i32_1 = arith.constant 0 : i32
    return %c0_i32, %c0_i32_0 : i32, i32
  }
  func.func @transform_6(%arg0: i32) -> (i32, i32) {
    %c0_i32 = arith.constant 0 : i32
    %c0_i32_0 = arith.constant 0 : i32
    return %arg0, %c0_i32 : i32, i32
  }
}

</mosaic_0001>

<bundles_post_ra>
// kernel: tpu_custom_call.1
= control target key start
LH: loop header
LB: loop body
LE: loop exit
PB: predicated region body
PF: predicated region fallthrough
CT: control target
= control target key end

     0   :  { %v222_v1 = vmov 3   ;;  %v223_v2 = vmov 1   ;;  %s345_s0 = inlined_call_operand.vmem [shape: f32[8,32], index: 0, kind: input, shape index: {}]   ;;  %s346_s1 = inlined_call_operand.vmem [shape: f32[8,4], index: 1, kind: input, shape index: {}]   ;;  %s347_s2 = inlined_call_operand.vmem [shape: f32[128,32], index: 2, kind: input, shape index: {}]   ;;  %s348_s3 = inlined_call_operand.vmem [shape: f32[4,32], index: 3, kind: input, shape index: {}]   ;;  %s349_s4 = inlined_call_operand.vmem [shape: f32[1,32], index: 4, kind: input, shape index: {}]   ;;  %s350_s5 = inlined_call_operand.vmem [shape: f32[1,32], index: 5, kind: input, shape index: {}]   ;;  %s351_s6 = inlined_call_operand.hbm [shape: f32[8,32], index: 6, kind: output, shape index: {}]  }
   0x1   :  { %v25_v0 = vld [vmem:[%s346_s1] sm:$0xff]  ;;  %183 = vset.pattern.permute.xlu1 %v222_v1  ;;  %181 = vset.pattern.permute.xlu0 %v223_v2 }
   0x2   :  { %43 = vperm.xlu1 %183, %v25_v0   ;;  %33 = vperm.xlu0 %181, %v25_v0  }
   0x3   :  { %11 = vsyncpa [#allocation3], 0  ;;  %v224_v3 = vmov 2   ;;  %v225_v4 = vmov 0   ;;  %v80_v5 = vld [vmem:[%s347_s2 + $0x78] sm:$0xff]  ;;  %v79_v6 = vld [vmem:[%s347_s2 + $0x70] sm:$0xff] }
   0x4   :  { %84 = vmatpush.msra.mxu0 %v80_v5  ;;  %v78_v7 = vld [vmem:[%s347_s2 + $0x68] sm:$0xff]  ;;  %v77_v8 = vld [vmem:[%s347_s2 + $0x60] sm:$0xff]  ;;  %v76_v9 = vld [vmem:[%s347_s2 + $0x58] sm:$0xff]  ;;  %s226_s14 = smov 96   ;;  %s227_s15 = smov 32   ;;  %vm59_vm0 = vcmask 261120  }
   0x5   :  { %v75_v10 = vld [vmem:[%s347_s2 + $0x50] sm:$0xff]  ;;  %v74_v11 = vld [vmem:[%s347_s2 + $0x48] sm:$0xff]  ;;  %v24_v12 = vld [vmem:[%s345_s0] sm:$0xff]  ;;  %s228_s16 = smov 64   ;;  %vm61_vm1 = vcmask 523264   ;;  %vm63_vm2 = vcmask 785408  }
   0x6   :  { %85 = vmatpush.msra.mxu0 %v79_v6  ;;  %v73_v19 = vld [vmem:[%s347_s2 + $0x40] sm:$0xff]  ;;  %v72_v20 = vld [vmem:[%s347_s2 + $0x38] sm:$0xff]  ;;  %v71_v21 = vld [vmem:[%s347_s2 + $0x30] sm:$0xff]  ;;  %v229_v50 = vmov 32.0   ;;  %s230_s19 = smov [#allocation2]   ;;  %s163_s22 = sshll.u32 %s351_s6, 4  ;;  %s164_s22 = int_to_ptr.hbm [resolvable:$true] %s163_s22 }
   0x7   :  { %v70_v22 = vld [vmem:[%s347_s2 + $0x28] sm:$0xff]  ;;  %v69_v23 = vld [vmem:[%s347_s2 + $0x20] sm:$0xff]  ;;  %v68_v24 = vld [vmem:[%s347_s2 + $0x18] sm:$0xff]  ;;  %192 = vrcp.f32 %v229_v50  ;;  %s161_s20 = sshll.u32 %s230_s19, 4  ;;  %s162_s20 = int_to_ptr.vmem [resolvable:$true] %s161_s20 }
   0x8   :  { %86 = vmatpush.msra.mxu0 %v78_v7  ;;  %v67_v25 = vld [vmem:[%s347_s2 + $0x10] sm:$0xff]  ;;  %v66_v26 = vld [vmem:[%s347_s2 + $0x8] sm:$0xff]  ;;  %v65_v27 = vld [vmem:[%s347_s2] sm:$0xff] }
   0x9   :  { %v189_v36 = vld [vmem:[%s348_s3] ss:$0 sm:$0xff]  ;;  %v187_v37 = vld [vmem:[%s348_s3 + $0x1] ss:$0 sm:$0xff]  ;;  %v188_v38 = vld [vmem:[%s348_s3 + $0x2] ss:$0 sm:$0xff] }
   0xa   :  { %182 = vset.pattern.permute.xlu0 %v224_v3  ;;  %184 = vset.pattern.permute.xlu1 %v225_v4  ;;  %v186_v41 = vld [vmem:[%s348_s3 + $0x3] ss:$0 sm:$0xff]  ;;  %v190_v7 = vld [vmem:[%s349_s4] ss:$0 sm:$0xff] }
   0xb   :  { %38 = vperm.xlu0 %182, %v25_v0   ;;  %28 = vperm.xlu1 %184, %v25_v0  }
   0xc   :  { %87 = vmatpush.msra.mxu0 %v77_v8 }
   0xd   :  { %v193_v51 = vpop.eup %192 }
   0xe   :  { %88 = vmatpush.msra.mxu0 %v76_v9  ;;  %v120_v52 = vmul.f32 32.0, %v193_v51  ;;  %vm124_vm3 = vweird.f32 %v193_v51 }
  0x10   :  { %89 = vmatpush.msra.mxu0 %v75_v10  ;;  %v121_v53 = vsub.f32 1.0, %v120_v52  ;;  %v191_v10 = vld [vmem:[%s350_s5] ss:$0 sm:$0xff] }
  0x12   :  { %90 = vmatpush.msra.mxu0 %v74_v11  ;;  %v122_v54 = vmul.f32 %v193_v51, %v121_v53 }
  0x13   :  { %185 = vset.pattern.permute.xlu0 %v222_v1 }
  0x14   :  { %91 = vmatpush.msra.mxu0 %v73_v19  ;;  %v123_v55 = vadd.f32 %v193_v51, %v122_v54 }
  0x16   :  { %92 = vmatpush.msra.mxu0 %v72_v20  ;;  %v125_v56 = vsel %vm124_vm3, %v193_v51, %v123_v55 }
  0x18   :  { %93 = vmatpush.msra.mxu0 %v71_v21 }
  0x1a   :  { %94 = vmatpush.msra.mxu0 %v70_v22 }
  0x1c   :  { %95 = vmatpush.msra.mxu0 %v69_v23 }
  0x1e   :  { %96 = vmatpush.msra.mxu0 %v68_v24 }
  0x20   :  { %97 = vmatpush.msra.mxu0 %v67_v25 }
  0x22   :  { %98 = vmatpush.msra.mxu0 %v66_v26 }
  0x24   :  { %99 = vmatpush.msra.mxu0 %v65_v27 }
  0x74   :  { %v44_v13 = vpop.permute.xlu1 %43  ;;  %v34_v14 = vpop.permute.xlu0 %33 }
  0x75   :  { %v46_v15 = vmul.f32 %v44_v13, %v24_v12  ;;  %v36_v16 = vmul.f32 %v34_v14, %v24_v12  ;;  %v106_v42 = vmul.f32 %v187_v37, %v34_v14  ;;  %v114_v46 = vmul.f32 %v186_v41, %v44_v13 }
  0x77   :  { %56 = vrot.lane.b32.xlu1 %v46_v15, %s226_s14  ;;  %48 = vrot.lane.b32.xlu2 %v36_v16, %s227_s15 }
  0x7d   :  { %v39_v17 = vpop.permute.xlu0 %38  ;;  %v29_v29 = vpop.permute.xlu1 %28 }
  0x7e   :  { %v41_v18 = vmul.f32 %v39_v17, %v24_v12  ;;  %v31_v30 = vmul.f32 %v29_v29, %v24_v12  ;;  %v83_v39 = vmul.f32 %v189_v36, %v29_v29  ;;  %v110_v44 = vmul.f32 %v188_v38, %v39_v17 }
  0x80   :  { %52 = vrot.lane.b32.xlu2 %v41_v18, %s228_s16 }
  0xd1   :  { %v49_v28 = vpop.permute.xlu2 %48 }
  0xd2   :  { %v60_v32 = vsel %vm59_vm0, %v31_v30, %v49_v28 }
  0xda   :  { %v53_v31 = vpop.permute.xlu2 %52 }
  0xdb   :  { %v62_v33 = vsel %vm61_vm1, %v60_v32, %v53_v31 }
  0xe9   :  { %v57_v34 = vpop.permute.xlu1 %56 }
  0xea   :  { %v64_v35 = vsel %vm63_vm2, %v62_v33, %v57_v34 }
  0xeb   :  { %100 = vmatmul.f32.vlgmr.msra.gmra.mxu0 %v64_v35 }
 0x168   :  { %v101_v40 = vpop.f32.mrf.mxu0 }
 0x169   :  { %v102_v43 = vadd.f32 %v101_v40, %v83_v39 }
 0x16b   :  { %v107_v45 = vadd.f32 %v106_v42, %v102_v43 }
 0x16d   :  { %v111_v47 = vadd.f32 %v110_v44, %v107_v45 }
 0x16f   :  { %v115_v48 = vadd.f32 %v114_v46, %v111_v47 }
 0x171   :  { %v116_v49 = vsel %vm59_vm0, %v115_v48, 0.0 }
 0x172   :  { %117 = vadd.xlane.f32.xlu2 %v116_v49 }
 0x1e5   :  { %v118_v57 = vpop.xlane.xlu2 %117 }
 0x1e6   :  { %v126_v58 = vmul.f32 %v125_v56, %v118_v57 }
 0x1e8   :  { %v127_v59 = vsub.f32 %v115_v48, %v126_v58 }
 0x1ea   :  { %v128_v60 = vmul.f32 %v127_v59, %v127_v59 }
 0x1ec   :  { %v129_v61 = vsel %vm59_vm0, %v128_v60, 0.0 }
 0x1ed   :  { %130 = vadd.xlane.f32.xlu0 %v129_v61 }
 0x260   :  { %v131_v62 = vpop.xlane.xlu0 %130 }
 0x261   :  { %v132_v63 = vmul.f32 %v131_v62, %v125_v56 }
 0x263   :  { %v133_v0 = vadd.f32 1e-05, %v132_v63 }
 0x265   :  { %194 = vrsqrt.f32 %v133_v0  ;;  %vm140_vm5 = vweird.f32 %v133_v0 }
 0x26b   :  { %v195_v1 = vpop.eup %194 }
 0x26c   :  { %v135_v2 = vmul.f32 %v195_v1, %v133_v0  ;;  %vm141_vm4 = vweird.f32 %v195_v1 }
 0x26d   :  { %vm142_vm6 = vmor %vm140_vm5, %vm141_vm4 }
 0x26e   :  { %v136_v3 = vmul.f32 %v195_v1, %v135_v2 }
 0x270   :  { %v137_v4 = vmul.f32 0.5, %v136_v3 }
 0x272   :  { %v138_v5 = vsub.f32 1.5, %v137_v4 }
 0x274   :  { %v139_v6 = vmul.f32 %v195_v1, %v138_v5 }
 0x276   :  { %v143_v8 = vsel %vm142_vm6, %v195_v1, %v139_v6 }
 0x277   :  { %v144_v9 = vmul.f32 %v143_v8, %v127_v59 }
 0x279   :  { %v149_v11 = vmul.f32 %v190_v7, %v144_v9 }
 0x27b   :  { %v154_v12 = vadd.f32 %v191_v10, %v149_v11 }
 0x27d   :  { %155 = vst.msk [vmem:[#allocation2] sm:$0xff] %vm59_vm0, %v154_v12 }
 0x27e   :  { %166 = dma.vmem_to_hbm [thread:$0]  %s162_s20, 128, %s164_s22, [#allocation3]  }
 0x27f   :  { %220 = dma.done.wait [#allocation3], 128  }
 0x280   :  { %221 = vsyncadd [#allocation3], 4294967168 }
 0x281   :  { %171 = vsyncpa [#allocation3], 1 }

</bundles_post_ra>
